<compile_context>
chip_gen: v7x
topology: tpu7x:2x2x1
jax: 0.10.0
libtpu: 0.0.40
codegen_flags: <defaults>
</compile_context>

<pallas_src>
import jax
import jax.numpy as jnp
from jax.experimental import pallas as pl
from jax.experimental.pallas import tpu as pltpu


def _scale_kernel(scale_ref, x_ref, o_ref):
    # scale_ref: (1, 1) f32 scalar in SMEM; x_ref/o_ref: 1-D or 2-D VMEM tiles.
    s = scale_ref[0, 0]
    # Multiply in the promoted dtype (f32 for bf16 inputs), cast back.
    o_ref[...] = (x_ref[...] * s).astype(o_ref.dtype)


def _chip_hints():
    """Best-effort TPU-generation hints; safe defaults if unknown.

    Returns (multi_tc, input_buffer_count):
      multi_tc          -> chip has 2 TensorCores sharing the grid (v7x-class,
                           v5p/v4 megacore); v5e/v6e are single-TC.
      input_buffer_count-> 3 only on v7x (3.2 TB/s HBM makes fixed DMA-issue
                           latency a larger fraction of each short step).
    """
    kind = ""
    try:
        kind = jax.devices()[0].device_kind.lower()
    except Exception:
        pass
    single_tc = any(t in kind for t in ("v5 lite", "v5e", "v6 lite", "v6e"))
    is_v7 = "v7" in kind
    return (not single_tc), (3 if is_v7 else 2)


def _choose_tiling(total, unit, target_units, even_grid):
    """Pick (tile, grid) along one axis.

    tile is a multiple of `unit` (or == total for a full-extent block);
    target_units is the desired elements-per-block along this axis.  When
    even_grid is set, the block count is nudged to an even number so both
    TensorCores of a 2-TC chip get equal work.
    """
    tile = max(unit, (max(1, target_units) // unit) * unit)
    if tile >= total:
        tile, grid = total, 1
        if even_grid and total >= 2 * unit:
            # Split the single full-array block in two for the 2 TensorCores.
            tile = pl.cdiv(pl.cdiv(total, 2), unit) * unit
            grid = pl.cdiv(total, tile)
        return tile, grid
    grid = pl.cdiv(total, tile)
    if even_grid and grid % 2 == 1:
        # Shave the tile so the block count becomes even (balanced split).
        tile = max(unit, pl.cdiv(pl.cdiv(total, grid + 1), unit) * unit)
        grid = pl.cdiv(total, tile)
    return tile, grid


def _block_spec(block_shape, index_map, buffers):
    """BlockSpec with optional deeper pipelining (fallback for older JAX)."""
    if buffers > 2:
        try:
            return pl.BlockSpec(block_shape, index_map,
                                pipeline_mode=pl.Buffered(buffers))
        except Exception:
            pass
    return pl.BlockSpec(block_shape, index_map)


def scale_forward(x, weight, *, max_lane=4096,
                  target_block_bytes=6 * 1024 * 1024):
    """Elementwise x * weight (weight is a scalar), Pallas TPU kernel."""
    orig_shape = x.shape
    orig_dtype = x.dtype
    n = x.size
    if n == 0:
        return x

    itemsize = x.dtype.itemsize
    # Sublane packing multiple per dtype (f32: 8, bf16: 16, int8/fp8: 32).
    sub = {4: 8, 2: 16, 1: 32}.get(itemsize, 8)

    multi_tc, in_buffers = _chip_hints()

    # Keep the weight in f32 so low-precision inputs are scaled in the
    # promoted dtype (as PyTorch does) before casting back.
    scale_arr = jnp.asarray(weight, dtype=jnp.float32).reshape(1, 1)

    cost = pl.CostEstimate(flops=n, transcendentals=0,
                           bytes_accessed=2 * n * itemsize)
    # 48 MiB scoped VMEM: covers ~30 MiB worst-case footprint, fits v7x's
    # 64 MiB physical VMEM, and lifts v5e's 16 MiB / v6e's 32 MiB defaults.
    cparams = pltpu.CompilerParams(
        dimension_semantics=("parallel",),
        vmem_limit_bytes=48 * 1024 * 1024,
    )

    x_flat = x.reshape(-1)

    if n % 128 == 0:
        # ---- Lane-dense 2-D path: no padding, exactly one read + one write.
        c = 128
        while (c * 2 <= max_lane and n % (c * 2) == 0
               and n // (c * 2) >= sub):
            c *= 2
        r = n // c
        bytes_per_row = c * itemsize
        tile_r, grid_r = _choose_tiling(
            r, sub, target_block_bytes // bytes_per_row, multi_tc)
        x2 = x_flat.reshape(r, c)

        out2 = pl.pallas_call(
            _scale_kernel,
            out_shape=jax.ShapeDtypeStruct((r, c), orig_dtype),
            grid_spec=pltpu.PrefetchScalarGridSpec(
                num_scalar_prefetch=0,
                grid=(grid_r,),
                in_specs=[
                    pl.BlockSpec(memory_space=pltpu.MemorySpace.SMEM),
                    _block_spec((tile_r, c), lambda i: (i, 0), in_buffers),
                ],
                out_specs=pl.BlockSpec((tile_r, c), lambda i: (i, 0)),
            ),
            compiler_params=cparams,
            cost_estimate=cost,
        )(scale_arr, x2)
        return out2.reshape(orig_shape)

    # ---- Ragged path: 1-D blocks, Pallas masks the partial last block.
    # (No jnp.pad / slice round-trips -> no extra HBM passes.)
    unit = 128 * sub
    tile, grid = _choose_tiling(
        n, unit, target_block_bytes // itemsize, multi_tc)

    out_flat = pl.pallas_call(
        _scale_kernel,
        out_shape=jax.ShapeDtypeStruct((n,), orig_dtype),
        grid_spec=pltpu.PrefetchScalarGridSpec(
            num_scalar_prefetch=0,
            grid=(grid,),
            in_specs=[
                pl.BlockSpec(memory_space=pltpu.MemorySpace.SMEM),
                _block_spec((tile,), lambda i: (i,), in_buffers),
            ],
            out_specs=pl.BlockSpec((tile,), lambda i: (i,)),
        ),
        compiler_params=cparams,
        cost_estimate=cost,
    )(scale_arr, x_flat)
    return out_flat.reshape(orig_shape)


class ScalePallas:
    """Mirror of the PyTorch Scale module (inference only)."""

    def __init__(self, scale=1):
        self.weight = jnp.array([float(scale)], dtype=jnp.float32)
        self.bias = None

    def set_scale(self, scale):
        self.weight = self.weight * float(scale)

    def __call__(self, x):
        return scale_forward(x, self.weight)


if __name__ == "__main__":
    key = jax.random.PRNGKey(0)
    # NCHW input consistent with a conv-style feature map.
    x = jax.random.normal(key, (2, 4, 16, 16), dtype=jnp.float32)

    mod = ScalePallas(scale=0.5)
    y = jax.block_until_ready(mod(x))

    # Reference check in plain JAX.
    y_ref = x * 0.5
    assert y.shape == x.shape and y.dtype == x.dtype
    assert jnp.allclose(y, y_ref, atol=1e-6, rtol=1e-6)

    # Exercise the ragged (non-%128) 1-D masked path.
    x_odd = jax.random.normal(jax.random.PRNGKey(1), (3, 5, 7),
                              dtype=jnp.float32)
    y_odd = jax.block_until_ready(mod(x_odd))
    assert y_odd.shape == x_odd.shape and y_odd.dtype == x_odd.dtype
    assert jnp.allclose(y_odd, x_odd * 0.5, atol=1e-6, rtol=1e-6)

    # Exercise the bf16 (promote-to-f32, cast-back) path.
    x_bf = jax.random.normal(jax.random.PRNGKey(2), (2, 4, 16, 16),
                             dtype=jnp.bfloat16)
    y_bf = jax.block_until_ready(mod(x_bf))
    assert y_bf.dtype == jnp.bfloat16
    assert jnp.allclose(y_bf.astype(jnp.float32),
                        (x_bf.astype(jnp.float32) * 0.5), atol=1e-2, rtol=1e-2)

    print("KERNEL_OK")
</pallas_src>

<mosaic_0001>
module attributes {stable_mosaic.version = 11 : i64} {
  func.func @_scale_kernel(%arg0: i32, %arg1: memref<1x1xf32, #tpu.memory_space<smem>>, %arg2: memref<8x256xf32, #tpu.memory_space<vmem>>, %arg3: memref<8x256xf32, #tpu.memory_space<vmem>>) attributes {dimension_semantics = [#tpu.dimension_semantics<parallel>], iteration_bounds = array<i64: 1>, scalar_prefetch = 0 : i64, scratch_operands = 0 : i64, tpu.core_type = #tpu.core_type<tc>, window_params = [{transform_indices = @transform_0, window_bounds = array<i64: 1, 1>}, {transform_indices = @transform_1, window_bounds = array<i64: 8, 256>}, {transform_indices = @transform_2, window_bounds = array<i64: 8, 256>}]} {
    %c0 = arith.constant 0 : index
    %c0_0 = arith.constant 0 : index
    %0 = memref.load %arg1[%c0, %c0_0] : memref<1x1xf32, #tpu.memory_space<smem>>
    %c0_1 = arith.constant 0 : index
    %c0_2 = arith.constant 0 : index
    %1 = vector.load %arg2[%c0_1, %c0_2] : memref<8x256xf32, #tpu.memory_space<vmem>>, vector<8x256xf32>
    %2 = vector.broadcast %0 : f32 to vector<8x256xf32>
    %3 = arith.mulf %1, %2 : vector<8x256xf32>
    %c0_3 = arith.constant 0 : index
    %c0_4 = arith.constant 0 : index
    %4 = vector.load %arg3[%c0_3, %c0_4] : memref<8x256xf32, #tpu.memory_space<vmem>>, vector<8x256xf32>
    tpu.vector_store %arg3[%c0_3, %c0_4], %3 {strides = array<i32>} : memref<8x256xf32, #tpu.memory_space<vmem>>, vector<8x256xf32>,
    return
  }
  func.func @transform_0(%arg0: i32) -> (i32, i32) {
    %c0_i32 = arith.constant 0 : i32
    %c0_i32_0 = arith.constant 0 : i32
    %c0_i32_1 = arith.constant 0 : i32
    return %c0_i32, %c0_i32_0 : i32, i32
  }
  func.func @transform_1(%arg0: i32) -> (i32, i32) {
    %c0_i32 = arith.constant 0 : i32
    %c0_i32_0 = arith.constant 0 : i32
    return %arg0, %c0_i32 : i32, i32
  }
  func.func @transform_2(%arg0: i32) -> (i32, i32) {
    %c0_i32 = arith.constant 0 : i32
    %c0_i32_0 = arith.constant 0 : i32
    return %arg0, %c0_i32 : i32, i32
  }
}

</mosaic_0001>

<bundles_post_ra>
// kernel: tpu_custom_call.1
= control target key start
LH: loop header
LB: loop body
LE: loop exit
PB: predicated region body
PF: predicated region fallthrough
CT: control target
= control target key end

     0   :  { %8 = vsyncpa [#allocation4], 0  ;;  %s142_s0 = inlined_call_operand.<no memory space> [shape: f32[1,1], index: 0, kind: input, shape index: {}]   ;;  %s143_s1 = inlined_call_operand.hbm [shape: f32[8,256], index: 1, kind: input, shape index: {}]   ;;  %s144_s2 = inlined_call_operand.hbm [shape: f32[8,256], index: 2, kind: output, shape index: {}]  }
   0x1   :  { %9 = vsyncpa [#allocation5], 0  ;;  %s98_s9 = smov [#allocation3]   ;;  %s50_s13 = scalar_lea.hbm %s143_s1, 256 }
   0x2   :  { %s18_s10 = sshll.u32 %s98_s9, 4  ;;  %p51_p0 = scmp.ne.s32.totalorder %s143_s1, %s50_s13  ;;  %s19_s10 = int_to_ptr.vmem [resolvable:$true] %s18_s10 }
   0x3   :  { %p54_p1 = scmp.lt.u32.totalorder %s50_s13, %s143_s1 }
   0x5   :  { %p56_p2 = pnand %p54_p1, %p51_p0 }
   0x7   :  { %59 = shalt.err (!%p56_p2)
}
   0x8   :  { %s60_s18 = scalar_lea.vmem %s19_s10, 256  ;;  %p65_p4 = scmp.lt.s32.totalorder %s19_s10, %s19_s10 }
   0x9   :  { %p61_p3 = scmp.ne.s32.totalorder %s19_s10, %s60_s18  ;;  %p66_p5 = scmp.lt.s32.totalorder %s60_s18, %s60_s18 }
   0xb   :  { %p67_p6 = por %p66_p5, %p65_p4 }
   0xd   :  { %p68_p7 = pnand %p67_p6, %p61_p3 }
   0xf   :  { %71 = shalt.err (!%p68_p7)
}
  0x10   :  { %21 = dma.hbm_to_vmem [thread:$0]  %s143_s1, 256, %s19_s10, [#allocation4]  }
  0x11   :  { %94 = dma.done.wait [#allocation4], 256  }
  0x12   :  { %95 = vsyncadd [#allocation4], 4294967040  ;;  %v28_v0 = vstv %s142_s0  ;;  %s99_s23 = smov [#allocation6]   ;;  %v26_v1 = vld [vmem:[#allocation3] sm:$0xff]  ;;  %v27_v2 = vld [vmem:[#allocation3 + $0x8] sm:$0xff] }
  0x13   :  { %s39_s24 = sshll.u32 %s99_s23, 4  ;;  %v29_v3 = vmul.f32 %v28_v0, %v26_v1  ;;  %v30_v4 = vmul.f32 %v28_v0, %v27_v2  ;;  %s40_s24 = int_to_ptr.vmem [resolvable:$true] %s39_s24 }
  0x14   :  { %s72_s25 = scalar_lea.vmem %s40_s24, 256  ;;  %p77_p9 = scmp.lt.s32.totalorder %s40_s24, %s40_s24 }
  0x15   :  { %31 = vst [vmem:[#allocation6] sm:$0xff] %v29_v3  ;;  %32 = vst [vmem:[#allocation6 + $0x8] sm:$0xff] %v30_v4  ;;  %p73_p8 = scmp.ne.s32.totalorder %s40_s24, %s72_s25  ;;  %p78_p10 = scmp.lt.s32.totalorder %s72_s25, %s72_s25 }
  0x17   :  { %p79_p11 = por %p78_p10, %p77_p9 }
  0x19   :  { %p80_p12 = pnand %p79_p11, %p73_p8 }
  0x1b   :  { %83 = shalt.err (!%p80_p12)
}
  0x1c   :  { %s84_s0 = scalar_lea.hbm %s144_s2, 256 }
  0x1d   :  { %p85_p13 = scmp.ne.s32.totalorder %s144_s2, %s84_s0  ;;  %p88_p0 = scmp.lt.u32.totalorder %s84_s0, %s144_s2 }
  0x1f   :  { %p90_p1 = pnand %p88_p0, %p85_p13 }
  0x21   :  { %93 = shalt.err (!%p90_p1)
}
  0x22   :  { %42 = dma.vmem_to_hbm [thread:$0]  %s40_s24, 256, %s144_s2, [#allocation5]  }
  0x23   :  { %96 = dma.done.wait [#allocation5], 256  }
  0x24   :  { %97 = vsyncadd [#allocation5], 4294967040 }
  0x25   :  { %46 = vsyncpa [#allocation4], 1 }
  0x26   :  { %47 = vsyncpa [#allocation5], 1 }

</bundles_post_ra>
